<compile_context>
chip_gen: v7x
topology: tpu7x:2x2x1
jax: 0.10.0
libtpu: 0.0.40
codegen_flags: <defaults>
</compile_context>

<pallas_src>
import functools

import jax
import jax.numpy as jnp
from jax.experimental import pallas as pl
from jax.experimental.pallas import tpu as pltpu

BN_EPS = 1e-5
LANE = 128


def _make_divisible(ch, divisor=8, min_ch=None):
    if min_ch is None:
        min_ch = divisor
    new_ch = max(min_ch, int(ch + divisor / 2) // divisor * divisor)
    if new_ch < 0.9 * ch:
        new_ch += divisor
    return new_ch


def _round_up(x, m):
    return (x + m - 1) // m * m


# ----------------------------- Pallas kernels -------------------------------

def _matmul_bias_act_kernel(x_ref, w_ref, b_ref, o_ref, *, relu6):
    acc = jnp.dot(x_ref[...], w_ref[...], preferred_element_type=jnp.float32)
    y = acc + b_ref[...]
    if relu6:
        y = jnp.clip(y, 0.0, 6.0)
    o_ref[...] = y.astype(o_ref.dtype)


def _matmul_bias_res_kernel(x_ref, w_ref, b_ref, r_ref, o_ref):
    # project 1x1 conv with the residual (shortcut) add fused in.
    acc = jnp.dot(x_ref[...], w_ref[...], preferred_element_type=jnp.float32)
    y = acc + b_ref[...] + r_ref[...].astype(jnp.float32)
    o_ref[...] = y.astype(o_ref.dtype)


def matmul_bias_act(x, w, bias, *, relu6, residual=None, tm_max=256):
    """y = x @ w + bias (+ residual) (optionally ReLU6), tiled over M rows."""
    M, K = x.shape
    C = w.shape[1]
    tm = min(tm_max, _round_up(M, 16))
    Mp = _round_up(M, tm)
    pad = Mp - M
    if pad:
        x = jnp.pad(x, ((0, pad), (0, 0)))
        if residual is not None:
            residual = jnp.pad(residual, ((0, pad), (0, 0)))

    in_specs = [
        pl.BlockSpec((tm, K), lambda i: (i, 0)),      # M-tiled activations
        pl.BlockSpec((K, C), lambda i: (0, 0)),       # weights stay resident
        pl.BlockSpec((1, C), lambda i: (0, 0)),       # folded-BN bias
    ]
    args = [x, w, bias.reshape(1, C)]
    if residual is None:
        kernel = functools.partial(_matmul_bias_act_kernel, relu6=relu6)
    else:
        kernel = _matmul_bias_res_kernel
        in_specs.append(pl.BlockSpec((tm, C), lambda i: (i, 0)))
        args.append(residual)

    out = pl.pallas_call(
        kernel,
        out_shape=jax.ShapeDtypeStruct((Mp, C), x.dtype),
        grid=(Mp // tm,),
        in_specs=in_specs,
        out_specs=pl.BlockSpec((tm, C), lambda i: (i, 0)),
        compiler_params=pltpu.CompilerParams(
            dimension_semantics=("parallel",),
            vmem_limit_bytes=32 * 1024 * 1024),
    )(*args)
    return out[:M] if pad else out


def _dwconv_bias_relu6_kernel(xp_ref, w_ref, b_ref, o_ref, *, H, W):
    # xp_ref: (1, H+2, W+2, C) padded image (bf16); w_ref: (9, C) folded taps (f32)
    # Unrolled 9-tap stride-1 depthwise accumulate in f32 on the VPU.
    acc = None
    for k in range(9):
        dy, dx = divmod(k, 3)
        tap = xp_ref[0, pl.ds(dy, H), pl.ds(dx, W), :].astype(jnp.float32)
        contrib = tap * w_ref[pl.ds(k, 1), :]          # (H, W, C) * (1, C)
        acc = contrib if acc is None else acc + contrib
    y = jnp.clip(acc + b_ref[...], 0.0, 6.0)
    o_ref[0] = y.astype(o_ref.dtype)


def dwconv3x3_bias_relu6(x, w9, bias, stride):
    """Depthwise 3x3 conv (padding=1) + folded-BN bias + ReLU6; w9: (9, C)."""
    N, H, W, C = x.shape
    xp = jnp.pad(x, ((0, 0), (1, 1), (1, 1), (0, 0)))
    kernel = functools.partial(_dwconv_bias_relu6_kernel, H=H, W=W)
    y = pl.pallas_call(
        kernel,
        out_shape=jax.ShapeDtypeStruct((N, H, W, C), x.dtype),
        grid=(N,),
        in_specs=[
            pl.BlockSpec((1, H + 2, W + 2, C), lambda n: (n, 0, 0, 0)),
            pl.BlockSpec((9, C), lambda n: (0, 0)),
            pl.BlockSpec((1, C), lambda n: (0, 0)),
        ],
        out_specs=pl.BlockSpec((1, H, W, C), lambda n: (n, 0, 0, 0)),
        compiler_params=pltpu.CompilerParams(
            dimension_semantics=("parallel",),
            vmem_limit_bytes=32 * 1024 * 1024),
    )(xp, w9, bias.reshape(1, C))
    if stride > 1:
        # TODO(synk): fold the stride into the kernel via strided pl.ds taps
        # instead of computing the dense output and subsampling in XLA.
        y = y[:, ::stride, ::stride, :]
    return y


def _avgpool_kernel(x_ref, o_ref):
    o_ref[...] = jnp.mean(x_ref[0].astype(jnp.float32), axis=0, keepdims=True)


def global_avg_pool(x):
    # x: (N, H, W, C) -> (N, C)   (AdaptiveAvgPool2d((1,1)) + flatten)
    N, H, W, C = x.shape
    xr = x.reshape(N, H * W, C)
    return pl.pallas_call(
        _avgpool_kernel,
        out_shape=jax.ShapeDtypeStruct((N, C), jnp.float32),
        grid=(N,),
        in_specs=[pl.BlockSpec((1, H * W, C), lambda n: (n, 0, 0))],
        out_specs=pl.BlockSpec((1, C), lambda n: (n, 0)),
        compiler_params=pltpu.CompilerParams(
            dimension_semantics=("parallel",)),
    )(xr)


# ------------------------------- glue (JAX) ---------------------------------

def _extract_patches_3x3(x, stride):
    """x: (N,H,W,C) -> ((N,Ho,Wo,9,C), Ho, Wo); padding=1 (PyTorch (k-1)//2)."""
    N, H, W, C = x.shape
    xp = jnp.pad(x, ((0, 0), (1, 1), (1, 1), (0, 0)))
    Ho = (H + 2 - 3) // stride + 1
    Wo = (W + 2 - 3) // stride + 1
    taps = []
    for dy in range(3):
        for dx in range(3):
            taps.append(
                xp[:, dy:dy + stride * Ho:stride, dx:dx + stride * Wo:stride, :])
    return jnp.stack(taps, axis=-2), Ho, Wo


def conv3x3_bias_relu6(x, w, bias, stride):
    # Stem conv (groups=1); w already reshaped/folded to (9*Cin, Cout).
    N, H, W, Cin = x.shape
    Cout = w.shape[1]
    p, Ho, Wo = _extract_patches_3x3(x, stride)          # (N, Ho, Wo, 9, Cin)
    pm = p.reshape(N * Ho * Wo, 9 * Cin)
    y = matmul_bias_act(pm, w, bias, relu6=True)
    return y.reshape(N, Ho, Wo, Cout)


def conv1x1_bias(x, w, bias, *, relu6, residual=None):
    N, H, W, Cin = x.shape
    Cout = w.shape[1]
    xm = x.reshape(N * H * W, Cin)
    rm = residual.reshape(N * H * W, Cout) if residual is not None else None
    y = matmul_bias_act(xm, w, bias, relu6=relu6, residual=rm)
    return y.reshape(N, H, W, Cout)


# ----------------------------- parameter init -------------------------------

def init_mobilenet_v2(key, num_cls=10, alpha=1.0, round_nearest=8):
    keys = iter(jax.random.split(key, 256))

    def kaiming(shape, fan_out):
        std = (2.0 / fan_out) ** 0.5           # kaiming_normal_, mode='fan_out'
        return std * jax.random.normal(next(keys), shape, dtype=jnp.float32)

    # Eval-mode BN folded into the weights (gamma=1, beta=0, mean=0, var=1):
    # scale = 1/sqrt(var+eps), bias = 0.
    bn_scale = 1.0 / (1.0 + BN_EPS) ** 0.5
    # TODO(synk): when loading trained weights, fold the real per-channel
    # gamma/sqrt(running_var+eps) into w and beta - mean*scale into bias.

    in_ch = _make_divisible(32 * alpha, round_nearest)
    last_ch = _make_divisible(1280 * alpha, round_nearest)

    params = {}
    w = kaiming((3, 3, 3, in_ch), 9 * in_ch) * bn_scale
    params['stem'] = {'w': w.reshape(9 * 3, in_ch).astype(jnp.bfloat16),
                      'bias': jnp.zeros((in_ch,), jnp.float32),
                      'stride': 2}

    setting = [[1, 16, 1, 1], [6, 24, 2, 2], [6, 32, 3, 2], [6, 64, 4, 2],
               [6, 96, 3, 1], [6, 160, 3, 2], [6, 320, 1, 1]]
    blocks = []
    for t, c, n, strd in setting:
        out_ch = _make_divisible(c * alpha, round_nearest)
        for i in range(n):
            stride = strd if i == 0 else 1
            hidden = in_ch * t
            blk = {'stride': stride,
                   'use_shortcut': (stride == 1 and in_ch == out_ch)}
            if t != 1:
                w = kaiming((in_ch, hidden), hidden) * bn_scale
                blk['expand'] = {'w': w.astype(jnp.bfloat16),
                                 'bias': jnp.zeros((hidden,), jnp.float32)}
            else:
                blk['expand'] = None
            # depthwise: fan_out = out_ch * 3*3 / groups = 9
            w = kaiming((3, 3, hidden), 9) * bn_scale
            blk['dw'] = {'w': w.reshape(9, hidden),          # f32 for VPU math
                         'bias': jnp.zeros((hidden,), jnp.float32)}
            w = kaiming((hidden, out_ch), out_ch) * bn_scale
            blk['project'] = {'w': w.astype(jnp.bfloat16),
                              'bias': jnp.zeros((out_ch,), jnp.float32)}
            blocks.append(blk)
            in_ch = out_ch
    params['blocks'] = blocks

    w = kaiming((in_ch, last_ch), last_ch) * bn_scale
    params['head'] = {'w': w.astype(jnp.bfloat16),
                      'bias': jnp.zeros((last_ch,), jnp.float32)}

    # Final Linear, zero-padded to a lane-dense (multiple-of-128) output width.
    num_cls_pad = _round_up(num_cls, LANE)
    fc_w = 0.01 * jax.random.normal(next(keys), (last_ch, num_cls), jnp.float32)
    params['fc'] = {
        'w': jnp.zeros((last_ch, num_cls_pad),
                       jnp.float32).at[:, :num_cls].set(fc_w),
        'b': jnp.zeros((num_cls_pad,), jnp.float32),
        'num_cls': num_cls,
    }
    return params


# -------------------------------- forward -----------------------------------

def mobilenet_v2_forward(params, x_nchw):
    # x_nchw: (N, 3, H, W) float32 — PyTorch NCHW input convention.
    x = jnp.transpose(x_nchw, (0, 2, 3, 1)).astype(jnp.bfloat16)   # -> NHWC

    st = params['stem']
    x = conv3x3_bias_relu6(x, st['w'], st['bias'], st['stride'])

    # TODO(synk): fuse expand -> dw -> project -> residual of each inverted
    # residual into one pallas_call over spatial tiles so the expanded hidden
    # activation never leaves VMEM.
    for blk in params['blocks']:
        y = x
        if blk['expand'] is not None:
            e = blk['expand']
            y = conv1x1_bias(y, e['w'], e['bias'], relu6=True)
        d = blk['dw']
        y = dwconv3x3_bias_relu6(y, d['w'], d['bias'], blk['stride'])
        p = blk['project']
        res = x if blk['use_shortcut'] else None       # fused residual add
        x = conv1x1_bias(y, p['w'], p['bias'], relu6=False, residual=res)

    h = params['head']
    x = conv1x1_bias(x, h['w'], h['bias'], relu6=True)

    x = global_avg_pool(x)                 # (N, last_channel) f32, + flatten
    # Dropout(p=0.2): identity in inference mode.
    fc = params['fc']
    logits = matmul_bias_act(x, fc['w'], fc['b'], relu6=False)
    return logits[:, :fc['num_cls']]


if __name__ == "__main__":
    key = jax.random.PRNGKey(0)
    pkey, xkey = jax.random.split(key)
    NUM_CLS = 10
    params = init_mobilenet_v2(pkey, num_cls=NUM_CLS, alpha=1.0)
    x = jax.random.normal(xkey, (2, 3, 32, 32), dtype=jnp.float32)  # NCHW
    logits = mobilenet_v2_forward(params, x)
    jax.block_until_ready(logits)
    assert logits.shape == (2, NUM_CLS), logits.shape
    assert bool(jnp.all(jnp.isfinite(logits)))
    print("KERNEL_OK")
</pallas_src>

<mosaic_0001>
module attributes {stable_mosaic.version = 11 : i64} {
  func.func @_matmul_bias_act_kernel(%arg0: i32, %arg1: memref<256x27xbf16, #tpu.memory_space<vmem>>, %arg2: memref<27x32xbf16, #tpu.memory_space<vmem>>, %arg3: memref<1x32xf32, #tpu.memory_space<vmem>>, %arg4: memref<256x32xbf16, #tpu.memory_space<vmem>>) attributes {dimension_semantics = [#tpu.dimension_semantics<parallel>], iteration_bounds = array<i64: 2>, scalar_prefetch = 0 : i64, scratch_operands = 0 : i64, tpu.core_type = #tpu.core_type<tc>, window_params = [{transform_indices = @transform_0, window_bounds = array<i64: 256, 27>}, {pipeline_mode = #tpu.pipeline_mode<synchronous>, transform_indices = @transform_1, window_bounds = array<i64: 27, 32>}, {pipeline_mode = #tpu.pipeline_mode<synchronous>, transform_indices = @transform_2, window_bounds = array<i64: 1, 32>}, {transform_indices = @transform_3, window_bounds = array<i64: 256, 32>}]} {
    %c0 = arith.constant 0 : index
    %c0_0 = arith.constant 0 : index
    %0 = vector.load %arg1[%c0, %c0_0] : memref<256x27xbf16, #tpu.memory_space<vmem>>, vector<256x27xbf16>
    %c0_1 = arith.constant 0 : index
    %c0_2 = arith.constant 0 : index
    %1 = vector.load %arg2[%c0_1, %c0_2] : memref<27x32xbf16, #tpu.memory_space<vmem>>, vector<27x32xbf16>
    %cst = arith.constant dense<0.000000e+00> : vector<256x32xf32>
    %2 = tpu.matmul %0, %1, %cst {dimension_numbers = #tpu.dot_dimension_numbers<[1], [0], [0], [1], [0, 0, 1, 1], [], []>} : vector<256x27xbf16>, vector<27x32xbf16>, vector<256x32xf32> -> vector<256x32xf32>
    %c0_3 = arith.constant 0 : index
    %c0_4 = arith.constant 0 : index
    %3 = vector.load %arg3[%c0_3, %c0_4] : memref<1x32xf32, #tpu.memory_space<vmem>>, vector<1x32xf32>
    %4 = vector.broadcast %3 : vector<1x32xf32> to vector<256x32xf32>
    %5 = arith.addf %2, %4 : vector<256x32xf32>
    %cst_5 = arith.constant 0.000000e+00 : f32
    %cst_6 = arith.constant 6.000000e+00 : f32
    %6 = vector.broadcast %cst_5 : f32 to vector<256x32xf32>
    %7 = arith.maximumf %6, %5 : vector<256x32xf32>
    %8 = vector.broadcast %cst_6 : f32 to vector<256x32xf32>
    %9 = arith.minimumf %8, %7 : vector<256x32xf32>
    %10 = arith.truncf %9 : vector<256x32xf32> to vector<256x32xbf16>
    %c0_7 = arith.constant 0 : index
    %c0_8 = arith.constant 0 : index
    %11 = vector.load %arg4[%c0_7, %c0_8] : memref<256x32xbf16, #tpu.memory_space<vmem>>, vector<256x32xbf16>
    tpu.vector_store %arg4[%c0_7, %c0_8], %10 {strides = array<i32>} : memref<256x32xbf16, #tpu.memory_space<vmem>>, vector<256x32xbf16>,
    return
  }
  func.func @transform_0(%arg0: i32) -> (i32, i32) {
    %c0_i32 = arith.constant 0 : i32
    %c0_i32_0 = arith.constant 0 : i32
    return %arg0, %c0_i32 : i32, i32
  }
  func.func @transform_1(%arg0: i32) -> (i32, i32) {
    %c0_i32 = arith.constant 0 : i32
    %c0_i32_0 = arith.constant 0 : i32
    %c0_i32_1 = arith.constant 0 : i32
    return %c0_i32, %c0_i32_0 : i32, i32
  }
  func.func @transform_2(%arg0: i32) -> (i32, i32) {
    %c0_i32 = arith.constant 0 : i32
    %c0_i32_0 = arith.constant 0 : i32
    %c0_i32_1 = arith.constant 0 : i32
    return %c0_i32, %c0_i32_0 : i32, i32
  }
  func.func @transform_3(%arg0: i32) -> (i32, i32) {
    %c0_i32 = arith.constant 0 : i32
    %c0_i32_0 = arith.constant 0 : i32
    return %arg0, %c0_i32 : i32, i32
  }
}

</mosaic_0001>

<bundles_post_ra>
// kernel: tpu_custom_call.1
= control target key start
LH: loop header
LB: loop body
LE: loop exit
PB: predicated region body
PF: predicated region fallthrough
CT: control target
= control target key end

     0   :  { %s1031_s12 = smov 0   ;;  %s1198_s0 = inlined_call_operand.vmem [shape: bf16[512,27], index: 0, kind: input, shape index: {}]   ;;  %s1199_s1 = inlined_call_operand.vmem [shape: bf16[27,32], index: 1, kind: input, shape index: {}]   ;;  %s1200_s2 = inlined_call_operand.vmem [shape: f32[1,32], index: 2, kind: input, shape index: {}]   ;;  %s1201_s3 = inlined_call_operand.vmem [shape: bf16[512,32], index: 3, kind: output, shape index: {}]  }
   0x1 LB: > { %s807_s13 = sadd.s32 4294967295, %s1008_s12   ;;  %p811_p0 = scmp.ge.s32.totalorder %s1008_s12, 1  ;;  %s1008_s12 = sphi %s1031_s12, %s13_s12  }
   0x2   : > { %p138_p1 = scmp.lt.s32.totalorder %s1008_s12, 3 }
   0x4   : > { %p139_p2 = pnand %p811_p0, %p138_p1 }
   0x5   : > { %v984_v0 = vld [vmem:[%s1199_s1] sm:$0xff] (!%p139_p2)   ;;  %vm358_vm0 = vcmask (!%p139_p2), 1044480   ;;  %v985_v1 = vld [vmem:[%s1199_s1 + $0x8] sm:$0x3f] (!%p139_p2)   ;;  %vm359_vm1 = vcmask (!%p139_p2), 1045504   ;;  %s812_s18 = sshll.u32 (!%p139_p2), %s807_s13, 5 }
   0x6   : > { %142 = sbr.rel (%p139_p2) target bundleno = 268 (0x10c), region = 32  ;;  %935 = vmatprep.subr.bf16.mxu0 (!%p139_p2), %v984_v0  ;;  %971 = vmatprep.subr.bf16.mxu1 (!%p139_p2), %v984_v0  ;;  %v1010_v2 = vmov (!%p139_p2), 65535   ;;  %p163_p3 = scmp.lt.s32.totalorder (!%p139_p2), %s812_s18, 63  ;;  %vm309_vm2 = vcmask (!%p139_p2), 220160   ;;  %v1090_v22 = vld [vmem:[%s1200_s2] ss:$0 sm:$0xff] (!%p139_p2) }
   0x7   : > { %936 = vmatpush3.bf16.msra.mxu0 (!%p139_p2), %v984_v0  ;;  %973 = vmatpush3.bf16.msra.mxu1 (!%p139_p2), %v984_v0  ;;  %v360_v3 = vsel (!%p139_p2), %vm358_vm0, 4294967295, %v1010_v2  ;;  %vm718_vm3 = vcmask (!%p139_p2), 257024  }
   0x8   : > { %v361_v4 = vsel (!%p139_p2), %vm359_vm1, %v360_v3, 0 }
   0x9   : > { %v363_v5 = vand.u32 (!%p139_p2), %v985_v1, %v361_v4 }
   0xb   : > { %937 = vmatprep.subr.bf16.mxu0 (!%p139_p2), %v363_v5  ;;  %972 = vmatprep.subr.bf16.mxu1 (!%p139_p2), %v363_v5 }
   0xc   : > { %938 = vmatpush3.bf16.msra.mxu0 (!%p139_p2), %v363_v5  ;;  %974 = vmatpush3.bf16.msra.mxu1 (!%p139_p2), %v363_v5 }
   0xd   : > { %s1203_s18 = smov (!%p163_p3, %s812_s18), 63 }
   0xe   : > { %s813_s19 = sshll.u32 %s1203_s18, 2 }
   0xf   : > { %s1053_s22 = scalar_lea.vmem %s1198_s0, %s813_s19  ;;  %s1105_s27 = scalar_lea.vmem %s1201_s3, %s813_s19 }
  0x10   : > { %v986_v6 = vld [vmem:[%s1053_s22] sm:$0xff]   ;;  %v988_v8 = vld [vmem:[%s1053_s22 + $0x8] sm:$0xff]   ;;  %v990_v10 = vld [vmem:[%s1053_s22 + $0x10] sm:$0xff]  }
  0x11   : > { %v987_v7 = vld [vmem:[%s1053_s22 + $0x40] sm:$0xff]   ;;  %939 = vmatprep.mubr.msk.bf16.mxu0 %vm309_vm2, %v986_v6  ;;  %v989_v9 = vld [vmem:[%s1053_s22 + $0x48] sm:$0xff]   ;;  %v991_v11 = vld [vmem:[%s1053_s22 + $0x50] sm:$0xff]  }
  0x12   : > { %955 = vmatprep.mubr.msk.bf16.mxu1 %vm309_vm2, %v987_v7  ;;  %940 = vmatmul.mubr.msk.bf16.vlgmr.msra.gmra.mrb[0].mxu0 %vm309_vm2, %v988_v8  ;;  %v992_v12 = vld [vmem:[%s1053_s22 + $0x18] sm:$0xff]   ;;  %v994_v14 = vld [vmem:[%s1053_s22 + $0x20] sm:$0xff]   ;;  %v996_v16 = vld [vmem:[%s1053_s22 + $0x28] sm:$0xff]  }
  0x13   : > { %956 = vmatmul.mubr.msk.bf16.vlgmr.msra.gmra.mrb[0].mxu1 %vm309_vm2, %v989_v9  ;;  %943 = vmatprep.mubr.msk.bf16.mxu0 %vm309_vm2, %v990_v10  ;;  %v993_v13 = vld [vmem:[%s1053_s22 + $0x58] sm:$0xff]   ;;  %v995_v15 = vld [vmem:[%s1053_s22 + $0x60] sm:$0xff]   ;;  %v997_v17 = vld [vmem:[%s1053_s22 + $0x68] sm:$0xff]  }
  0x14   : > { %959 = vmatprep.mubr.msk.bf16.mxu1 %vm309_vm2, %v991_v11  ;;  %v998_v18 = vld [vmem:[%s1053_s22 + $0x30] sm:$0xff]   ;;  %v1000_v20 = vld [vmem:[%s1053_s22 + $0x38] sm:$0xff]  }
  0x15   : > { %v999_v19 = vld [vmem:[%s1053_s22 + $0x70] sm:$0xff]   ;;  %v1001_v21 = vld [vmem:[%s1053_s22 + $0x78] sm:$0xff]  }
  0x1a   : > { %944 = vmatmul.mubr.msk.bf16.gmra.mrb[4].mxu0 %vm309_vm2, %v992_v12 }
  0x1b   : > { %960 = vmatmul.mubr.msk.bf16.gmra.mrb[4].mxu1 %vm309_vm2, %v993_v13  ;;  %947 = vmatprep.mubr.msk.bf16.mxu0 %vm309_vm2, %v994_v14 }
  0x1c   : > { %963 = vmatprep.mubr.msk.bf16.mxu1 %vm309_vm2, %v995_v15 }
  0x22   : > { %948 = vmatmul.mubr.msk.bf16.gmra.mrb[8].mxu0 %vm309_vm2, %v996_v16 }
  0x23   : > { %964 = vmatmul.mubr.msk.bf16.gmra.mrb[8].mxu1 %vm309_vm2, %v997_v17  ;;  %951 = vmatprep.mubr.msk.bf16.mxu0 %vm309_vm2, %v998_v18 }
  0x24   : > { %967 = vmatprep.mubr.msk.bf16.mxu1 %vm309_vm2, %v999_v19 }
  0x2a   : > { %952 = vmatmul.mubr.msk.bf16.gmra.mrb[12].mxu0 %vm309_vm2, %v1000_v20 }
  0x2b   : > { %968 = vmatmul.mubr.msk.bf16.gmra.mrb[12].mxu1 %vm309_vm2, %v1001_v21 }
  0xe5   : > { %v941_v23 = vpop.f32.mrb[0].mxu0 }
  0xe6   : > { %v408_v24 = vadd.f32 %v941_v23, %v1090_v22  ;;  %v957_v25 = vpop.f32.mrb[0].mxu1  ;;  %v399_v26 = vpop.f32.mrb[1].mxu0 }
  0xe7   : > { %v472_v27 = vadd.f32 %v957_v25, %v1090_v22  ;;  %v400_v28 = vadd.f32 %v1090_v22, %v399_v26  ;;  %v463_v29 = vpop.f32.mrb[1].mxu1  ;;  %v942_v30 = vpop.f32.mrb[2].mxu0 }
  0xe8   : > { %v528_v31 = vmax.f32 %v408_v24, 0.0  ;;  %v464_v32 = vadd.f32 %v1090_v22, %v463_v29  ;;  %v411_v33 = vadd.f32 %v942_v30, %v1090_v22  ;;  %v958_v34 = vpop.f32.mrb[2].mxu1  ;;  %v402_v35 = vpop.f32.mrb[3].mxu0 }
  0xe9   : > { %v544_v36 = vmax.f32 %v472_v27, 0.0  ;;  %v526_v37 = vmax.f32 %v400_v28, 0.0  ;;  %v475_v38 = vadd.f32 %v958_v34, %v1090_v22  ;;  %v403_v39 = vadd.f32 %v1090_v22, %v402_v35  ;;  %v466_v40 = vpop.f32.mrb[3].mxu1 }
  0xea   : > { %v560_v41 = vmin.f32 %v528_v31, 6.0  ;;  %v542_v42 = vmax.f32 %v464_v32, 0.0  ;;  %v529_v43 = vmax.f32 %v411_v33, 0.0  ;;  %v467_v44 = vadd.f32 %v1090_v22, %v466_v40 }
  0xeb   : > { %v576_v45 = vmin.f32 %v544_v36, 6.0  ;;  %v558_v46 = vmin.f32 %v526_v37, 6.0  ;;  %v545_v47 = vmax.f32 %v475_v38, 0.0  ;;  %v527_v48 = vmax.f32 %v403_v39, 0.0 }
  0xec   : > { %v887_v49 = vpack.c.bf16 %v560_v41, %v560_v41  ;;  %v574_v50 = vmin.f32 %v542_v42, 6.0  ;;  %v561_v51 = vmin.f32 %v529_v43, 6.0  ;;  %v543_v52 = vmax.f32 %v467_v44, 0.0 }
  0xed   : > { %v903_v53 = vpack.c.bf16 %v576_v45, %v576_v45  ;;  %v885_v54 = vpack.c.bf16 %v558_v46, %v558_v46  ;;  %v577_v55 = vmin.f32 %v545_v47, 6.0  ;;  %v559_v56 = vmin.f32 %v527_v48, 6.0  ;;  %v945_v57 = vpop.f32.mrb[4].mxu0 }
  0xee   : > { %721 = vst.msk [vmem:[%s1105_s27 + $0x8] sm:$0xf] %vm718_vm3, %v887_v49  ;;  %v901_v58 = vpack.c.bf16 %v574_v50, %v574_v50  ;;  %v888_v59 = vpack.c.bf16 %v561_v51, %v561_v51  ;;  %v575_v60 = vmin.f32 %v543_v52, 6.0  ;;  %v424_v61 = vadd.f32 %v945_v57, %v1090_v22  ;;  %v961_v62 = vpop.f32.mrb[4].mxu1  ;;  %v415_v63 = vpop.f32.mrb[5].mxu0 }
  0xef   : > { %737 = vst.msk [vmem:[%s1105_s27 + $0x48] sm:$0xf] %vm718_vm3, %v903_v53  ;;  %719 = vst.msk [vmem:[%s1105_s27] sm:$0xf] %vm718_vm3, %v885_v54  ;;  %v904_v0 = vpack.c.bf16 %v577_v55, %v577_v55  ;;  %v886_v1 = vpack.c.bf16 %v559_v56, %v559_v56  ;;  %v488_v2 = vadd.f32 %v961_v62, %v1090_v22  ;;  %v479_v4 = vpop.f32.mrb[5].mxu1  ;;  %v946_v5 = vpop.f32.mrb[6].mxu0 }
  0xf0   : > { %v416_v3 = vadd.f32 %v1090_v22, %v415_v63  ;;  %735 = vst.msk [vmem:[%s1105_s27 + $0x40] sm:$0xf] %vm718_vm3, %v901_v58  ;;  %722 = vst.msk [vmem:[%s1105_s27 + $0xc] sm:$0xf] %vm718_vm3, %v888_v59  ;;  %v902_v6 = vpack.c.bf16 %v575_v60, %v575_v60  ;;  %v532_v7 = vmax.f32 %v424_v61, 0.0  ;;  %v480_v8 = vadd.f32 %v1090_v22, %v479_v4  ;;  %v962_v10 = vpop.f32.mrb[6].mxu1 }
  0xf1   : > { %v427_v9 = vadd.f32 %v946_v5, %v1090_v22  ;;  %v418_v11 = vpop.f32.mrb[7].mxu0  ;;  %738 = vst.msk [vmem:[%s1105_s27 + $0x4c] sm:$0xf] %vm718_vm3, %v904_v0  ;;  %720 = vst.msk [vmem:[%s1105_s27 + $0x4] sm:$0xf] %vm718_vm3, %v886_v1  ;;  %v548_v12 = vmax.f32 %v488_v2, 0.0  ;;  %v491_v14 = vadd.f32 %v962_v10, %v1090_v22 }
  0xf2   : > { %v530_v13 = vmax.f32 %v416_v3, 0.0  ;;  %v419_v15 = vadd.f32 %v1090_v22, %v418_v11  ;;  %v482_v16 = vpop.f32.mrb[7].mxu1  ;;  %736 = vst.msk [vmem:[%s1105_s27 + $0x44] sm:$0xf] %vm718_vm3, %v902_v6  ;;  %v564_v17 = vmin.f32 %v532_v7, 6.0  ;;  %v546_v18 = vmax.f32 %v480_v8, 0.0 }
  0xf3   : > { %v533_v19 = vmax.f32 %v427_v9, 0.0  ;;  %v483_v20 = vadd.f32 %v1090_v22, %v482_v16  ;;  %v580_v21 = vmin.f32 %v548_v12, 6.0  ;;  %v549_v24 = vmax.f32 %v491_v14, 0.0 }
  0xf4   : > { %v562_v23 = vmin.f32 %v530_v13, 6.0  ;;  %v531_v25 = vmax.f32 %v419_v15, 0.0  ;;  %v891_v26 = vpack.c.bf16 %v564_v17, %v564_v17  ;;  %v578_v27 = vmin.f32 %v546_v18, 6.0 }
  0xf5   : > { %v565_v28 = vmin.f32 %v533_v19, 6.0  ;;  %v547_v29 = vmax.f32 %v483_v20, 0.0  ;;  %v907_v30 = vpack.c.bf16 %v580_v21, %v580_v21  ;;  %v581_v32 = vmin.f32 %v549_v24, 6.0  ;;  %v949_v34 = vpop.f32.mrb[8].mxu0 }
  0xf6   : > { %v889_v31 = vpack.c.bf16 %v562_v23, %v562_v23  ;;  %v563_v33 = vmin.f32 %v531_v25, 6.0  ;;  %725 = vst.msk [vmem:[%s1105_s27 + $0x18] sm:$0xf] %vm718_vm3, %v891_v26  ;;  %v905_v35 = vpack.c.bf16 %v578_v27, %v578_v27  ;;  %v440_v38 = vadd.f32 %v949_v34, %v1090_v22  ;;  %v965_v39 = vpop.f32.mrb[8].mxu1  ;;  %v431_v40 = vpop.f32.mrb[9].mxu0 }
  0xf7   : > { %v892_v36 = vpack.c.bf16 %v565_v28, %v565_v28  ;;  %v579_v37 = vmin.f32 %v547_v29, 6.0  ;;  %741 = vst.msk [vmem:[%s1105_s27 + $0x58] sm:$0xf] %vm718_vm3, %v907_v30  ;;  %v908_v41 = vpack.c.bf16 %v581_v32, %v581_v32  ;;  %v504_v43 = vadd.f32 %v965_v39, %v1090_v22  ;;  %v495_v45 = vpop.f32.mrb[9].mxu1  ;;  %v950_v46 = vpop.f32.mrb[10].mxu0 }
  0xf8   : > { %723 = vst.msk [vmem:[%s1105_s27 + $0x10] sm:$0xf] %vm718_vm3, %v889_v31  ;;  %v890_v42 = vpack.c.bf16 %v563_v33, %v563_v33  ;;  %v432_v44 = vadd.f32 %v1090_v22, %v431_v40  ;;  %739 = vst.msk [vmem:[%s1105_s27 + $0x50] sm:$0xf] %vm718_vm3, %v905_v35  ;;  %v536_v48 = vmax.f32 %v440_v38, 0.0  ;;  %v496_v49 = vadd.f32 %v1090_v22, %v495_v45  ;;  %v966_v51 = vpop.f32.mrb[10].mxu1 }
  0xf9   : > { %726 = vst.msk [vmem:[%s1105_s27 + $0x1c] sm:$0xf] %vm718_vm3, %v892_v36  ;;  %v906_v47 = vpack.c.bf16 %v579_v37, %v579_v37  ;;  %v443_v50 = vadd.f32 %v950_v46, %v1090_v22  ;;  %v434_v52 = vpop.f32.mrb[11].mxu0  ;;  %742 = vst.msk [vmem:[%s1105_s27 + $0x5c] sm:$0xf] %vm718_vm3, %v908_v41  ;;  %v552_v53 = vmax.f32 %v504_v43, 0.0  ;;  %v507_v55 = vadd.f32 %v966_v51, %v1090_v22 }
  0xfa   : > { %724 = vst.msk [vmem:[%s1105_s27 + $0x14] sm:$0xf] %vm718_vm3, %v890_v42  ;;  %v534_v54 = vmax.f32 %v432_v44, 0.0  ;;  %v435_v56 = vadd.f32 %v1090_v22, %v434_v52  ;;  %v498_v57 = vpop.f32.mrb[11].mxu1  ;;  %v568_v58 = vmin.f32 %v536_v48, 6.0  ;;  %v550_v59 = vmax.f32 %v496_v49, 0.0 }
  0xfb   : > { %740 = vst.msk [vmem:[%s1105_s27 + $0x54] sm:$0xf] %vm718_vm3, %v906_v47  ;;  %v537_v60 = vmax.f32 %v443_v50, 0.0  ;;  %v499_v61 = vadd.f32 %v1090_v22, %v498_v57  ;;  %v584_v62 = vmin.f32 %v552_v53, 6.0  ;;  %v553_v0 = vmax.f32 %v507_v55, 0.0 }
  0xfc   : > { %v566_v63 = vmin.f32 %v534_v54, 6.0  ;;  %v535_v1 = vmax.f32 %v435_v56, 0.0  ;;  %v895_v2 = vpack.c.bf16 %v568_v58, %v568_v58  ;;  %v582_v3 = vmin.f32 %v550_v59, 6.0 }
  0xfd   : > { %v569_v4 = vmin.f32 %v537_v60, 6.0  ;;  %v551_v5 = vmax.f32 %v499_v61, 0.0  ;;  %v911_v6 = vpack.c.bf16 %v584_v62, %v584_v62  ;;  %v585_v8 = vmin.f32 %v553_v0, 6.0  ;;  %v953_v10 = vpop.f32.mrb[12].mxu0 }
  0xfe   : > { %v893_v7 = vpack.c.bf16 %v566_v63, %v566_v63  ;;  %v567_v9 = vmin.f32 %v535_v1, 6.0  ;;  %729 = vst.msk [vmem:[%s1105_s27 + $0x28] sm:$0xf] %vm718_vm3, %v895_v2  ;;  %v909_v11 = vpack.c.bf16 %v582_v3, %v582_v3  ;;  %v456_v14 = vadd.f32 %v953_v10, %v1090_v22  ;;  %v969_v15 = vpop.f32.mrb[12].mxu1  ;;  %v447_v16 = vpop.f32.mrb[13].mxu0 }
  0xff   : > { %v896_v12 = vpack.c.bf16 %v569_v4, %v569_v4  ;;  %v583_v13 = vmin.f32 %v551_v5, 6.0  ;;  %745 = vst.msk [vmem:[%s1105_s27 + $0x68] sm:$0xf] %vm718_vm3, %v911_v6  ;;  %v912_v17 = vpack.c.bf16 %v585_v8, %v585_v8  ;;  %v520_v19 = vadd.f32 %v969_v15, %v1090_v22  ;;  %v511_v21 = vpop.f32.mrb[13].mxu1  ;;  %v954_v23 = vpop.f32.mrb[14].mxu0 }
 0x100   : > { %727 = vst.msk [vmem:[%s1105_s27 + $0x20] sm:$0xf] %vm718_vm3, %v893_v7  ;;  %v894_v18 = vpack.c.bf16 %v567_v9, %v567_v9  ;;  %v448_v20 = vadd.f32 %v1090_v22, %v447_v16  ;;  %743 = vst.msk [vmem:[%s1105_s27 + $0x60] sm:$0xf] %vm718_vm3, %v909_v11  ;;  %v540_v25 = vmax.f32 %v456_v14, 0.0  ;;  %v512_v26 = vadd.f32 %v1090_v22, %v511_v21  ;;  %v970_v28 = vpop.f32.mrb[14].mxu1 }
 0x101   : > { %730 = vst.msk [vmem:[%s1105_s27 + $0x2c] sm:$0xf] %vm718_vm3, %v896_v12  ;;  %v910_v24 = vpack.c.bf16 %v583_v13, %v583_v13  ;;  %v459_v27 = vadd.f32 %v954_v23, %v1090_v22  ;;  %v450_v29 = vpop.f32.mrb[15].mxu0  ;;  %746 = vst.msk [vmem:[%s1105_s27 + $0x6c] sm:$0xf] %vm718_vm3, %v912_v17  ;;  %v556_v30 = vmax.f32 %v520_v19, 0.0  ;;  %v523_v32 = vadd.f32 %v970_v28, %v1090_v22 }
 0x102   : > { %728 = vst.msk [vmem:[%s1105_s27 + $0x24] sm:$0xf] %vm718_vm3, %v894_v18  ;;  %v538_v31 = vmax.f32 %v448_v20, 0.0  ;;  %v451_v33 = vadd.f32 %v1090_v22, %v450_v29  ;;  %v514_v34 = vpop.f32.mrb[15].mxu1  ;;  %v572_v35 = vmin.f32 %v540_v25, 6.0  ;;  %v554_v36 = vmax.f32 %v512_v26, 0.0 }
 0x103   : > { %744 = vst.msk [vmem:[%s1105_s27 + $0x64] sm:$0xf] %vm718_vm3, %v910_v24  ;;  %v541_v37 = vmax.f32 %v459_v27, 0.0  ;;  %v515_v38 = vadd.f32 %v1090_v22, %v514_v34  ;;  %v588_v39 = vmin.f32 %v556_v30, 6.0  ;;  %v557_v41 = vmax.f32 %v523_v32, 0.0 }
 0x104   : > { %v570_v40 = vmin.f32 %v538_v31, 6.0  ;;  %v539_v42 = vmax.f32 %v451_v33, 0.0  ;;  %v899_v43 = vpack.c.bf16 %v572_v35, %v572_v35  ;;  %v586_v44 = vmin.f32 %v554_v36, 6.0 }
 0x105   : > { %v573_v45 = vmin.f32 %v541_v37, 6.0  ;;  %v555_v46 = vmax.f32 %v515_v38, 0.0  ;;  %v915_v47 = vpack.c.bf16 %v588_v39, %v588_v39  ;;  %v589_v49 = vmin.f32 %v557_v41, 6.0 }
 0x106   : > { %v897_v48 = vpack.c.bf16 %v570_v40, %v570_v40  ;;  %v571_v50 = vmin.f32 %v539_v42, 6.0  ;;  %733 = vst.msk [vmem:[%s1105_s27 + $0x38] sm:$0xf] %vm718_vm3, %v899_v43  ;;  %v913_v22 = vpack.c.bf16 %v586_v44, %v586_v44 }
 0x107   : > { %v900_v51 = vpack.c.bf16 %v573_v45, %v573_v45  ;;  %v587_v52 = vmin.f32 %v555_v46, 6.0  ;;  %749 = vst.msk [vmem:[%s1105_s27 + $0x78] sm:$0xf] %vm718_vm3, %v915_v47  ;;  %v916_v53 = vpack.c.bf16 %v589_v49, %v589_v49 }
 0x108   : > { %731 = vst.msk [vmem:[%s1105_s27 + $0x30] sm:$0xf] %vm718_vm3, %v897_v48  ;;  %v898_v54 = vpack.c.bf16 %v571_v50, %v571_v50  ;;  %747 = vst.msk [vmem:[%s1105_s27 + $0x70] sm:$0xf] %vm718_vm3, %v913_v22 }
 0x109   : > { %734 = vst.msk [vmem:[%s1105_s27 + $0x3c] sm:$0xf] %vm718_vm3, %v900_v51  ;;  %v914_v55 = vpack.c.bf16 %v587_v52, %v587_v52  ;;  %750 = vst.msk [vmem:[%s1105_s27 + $0x7c] sm:$0xf] %vm718_vm3, %v916_v53 }
 0x10a   : > { %732 = vst.msk [vmem:[%s1105_s27 + $0x34] sm:$0xf] %vm718_vm3, %v898_v54 }
 0x10b   : > { %748 = vst.msk [vmem:[%s1105_s27 + $0x74] sm:$0xf] %vm718_vm3, %v914_v55 }
 0x10c PF: > { %s13_s12 = sadd.s32 1, %s1008_s12  }
 0x10d   : > { %p10_p4 = scmp.ge.s32.totalorder %s13_s12, 4  }
 0x10f   :  { %12 = sbr.rel (!%p10_p4) target bundleno = 1 (0x1), region = 62 }

</bundles_post_ra>
